<compile_context>
chip_gen: v7x
topology: tpu7x:2x2x1
jax: 0.10.0
libtpu: 0.0.40
codegen_flags: <defaults>
</compile_context>

<pallas_src>
import jax
import jax.numpy as jnp
from jax.experimental import pallas as pl
from jax.experimental.pallas import tpu as pltpu

SUBLANE = 8              # f32 sublane granularity for the batch tile
DEFAULT_TILE_B = 2048    # tiny per-tile footprint; amortizes per-step overhead


def _round_up(n, m):
    return ((n + m - 1) // m) * m


def _policy_kernel(x_ref, w1_ref, b1_ref, w2_ref, b2_ref, o_ref):
    # fc1 + ReLU: cast the f32 x tile to the weights' MXU dtype in-kernel
    # (no extra wrapper HBM pass); accumulate in f32; f32 bias + ReLU.
    x = x_ref[...].astype(w1_ref.dtype)
    h = jnp.dot(x, w1_ref[...], preferred_element_type=jnp.float32)
    h = jnp.maximum(h + b1_ref[...], 0.0)

    # fc2 at natural action_dim width -> no padded-column masking needed.
    logits = jnp.dot(h.astype(w2_ref.dtype), w2_ref[...],
                     preferred_element_type=jnp.float32)
    logits = logits + b2_ref[...]

    # Numerically stable softmax over the action axis, all in f32.
    m = jnp.max(logits, axis=1, keepdims=True)
    e = jnp.exp(logits - m)
    denom = jnp.sum(e, axis=1, keepdims=True)
    # EUP approx reciprocal + one Newton step: ~full f32 accuracy, no VPU divide.
    inv = pl.reciprocal(denom, approx=True)
    inv = inv * (2.0 - denom * inv)
    o_ref[...] = (e * inv).astype(o_ref.dtype)


def policy_net_forward(x, packed_params, *, tile_b=DEFAULT_TILE_B):
    """x: [batch, state_dim] f32.  packed_params = (w1, b1, w2, b2) with
    weights pre-transposed to [in_features, out_features] (bf16) and biases
    [1, out_features] f32.  Returns f32 probabilities [batch, action_dim]."""
    w1, b1, w2, b2 = packed_params
    batch, state_dim = x.shape
    hidden_dim = w1.shape[1]
    action_dim = w2.shape[1]

    # Batch tile: block 2nd-to-last dim must be a multiple of 8 OR the full
    # batch.  Keep >= 2 grid steps when the batch allows (v7x has 2 TCs).
    if batch <= SUBLANE:
        tb = batch
    else:
        tb = min(tile_b, _round_up(batch, SUBLANE))
        if pl.cdiv(batch, tb) < 2:
            tb = max(SUBLANE, _round_up(pl.cdiv(batch, 2), SUBLANE))
    grid = (pl.cdiv(batch, tb),)

    w_bytes = jnp.dtype(w1.dtype).itemsize
    cost = pl.CostEstimate(
        flops=2 * batch * (state_dim * hidden_dim + hidden_dim * action_dim),
        transcendentals=batch * action_dim,
        bytes_accessed=(batch * state_dim * 4                                   # x (f32)
                        + (state_dim * hidden_dim + hidden_dim * action_dim) * w_bytes
                        + (hidden_dim + action_dim) * 4                         # biases
                        + batch * action_dim * 4),                              # out (narrow)
    )

    return pl.pallas_call(
        _policy_kernel,
        out_shape=jax.ShapeDtypeStruct((batch, action_dim), jnp.float32),
        grid=grid,
        in_specs=[
            pl.BlockSpec((tb, state_dim), lambda i: (i, 0)),          # x: tiled over batch
            pl.BlockSpec((state_dim, hidden_dim), lambda i: (0, 0)),  # w1: VMEM-resident
            pl.BlockSpec((1, hidden_dim), lambda i: (0, 0)),          # b1: resident
            pl.BlockSpec((hidden_dim, action_dim), lambda i: (0, 0)), # w2: resident
            pl.BlockSpec((1, action_dim), lambda i: (0, 0)),          # b2: resident
        ],
        out_specs=pl.BlockSpec((tb, action_dim), lambda i: (i, 0)),   # narrow output
        compiler_params=pltpu.CompilerParams(
            # Batch tiles are independent; on v7x consider CORE_PARALLEL once
            # it is the sole deployment target.
            dimension_semantics=("parallel",),
            vmem_limit_bytes=32 * 1024 * 1024,  # safe guardrail incl. v7x's 64 MiB VMEM
        ),
        cost_estimate=cost,
    )(x, w1, b1, w2, b2)


def init_params(key, state_dim, hidden_dim, action_dim):
    """nn.Linear-style init (uniform +-1/sqrt(fan_in)); f32, weights stored
    pre-transposed as [in_features, out_features]."""
    k1, k2, k3, k4 = jax.random.split(key, 4)
    lim1 = 1.0 / jnp.sqrt(state_dim)
    lim2 = 1.0 / jnp.sqrt(hidden_dim)
    w1 = jax.random.uniform(k1, (state_dim, hidden_dim), jnp.float32, -lim1, lim1)
    b1 = jax.random.uniform(k2, (1, hidden_dim), jnp.float32, -lim1, lim1)
    w2 = jax.random.uniform(k3, (hidden_dim, action_dim), jnp.float32, -lim2, lim2)
    b2 = jax.random.uniform(k4, (1, action_dim), jnp.float32, -lim2, lim2)
    return w1, b1, w2, b2


def pack_params(w1, b1, w2, b2, compute_dtype=jnp.bfloat16):
    """Cast weights to the MXU compute dtype; biases stay f32.  No padding:
    the kernel runs at natural hidden/action widths and emits a narrow
    (batch, action_dim) output (the dominant-HBM-stream fix)."""
    return (w1.astype(compute_dtype), b1, w2.astype(compute_dtype), b2)


if __name__ == "__main__":
    # Small shapes consistent with the module: state_dim=4, hidden_dim=32, action_dim=8.
    batch, state_dim, hidden_dim, action_dim = 2, 4, 32, 8

    key = jax.random.PRNGKey(0)
    kx, kp, kb = jax.random.split(key, 3)
    x = jax.random.normal(kx, (batch, state_dim), jnp.float32)
    w1, b1, w2, b2 = init_params(kp, state_dim, hidden_dim, action_dim)
    packed = pack_params(w1, b1, w2, b2, compute_dtype=jnp.bfloat16)
    w1p, b1p, w2p, b2p = packed

    probs = jax.block_until_ready(policy_net_forward(x, packed))
    assert probs.shape == (batch, action_dim)

    # Reference 1: same mixed precision as the kernel (bf16 operands, f32 accum) — tight.
    def ref_mixed(xq):
        hq = jnp.maximum(
            jnp.dot(xq.astype(jnp.bfloat16), w1p, preferred_element_type=jnp.float32) + b1p, 0.0)
        logits = jnp.dot(hq.astype(jnp.bfloat16), w2p,
                         preferred_element_type=jnp.float32) + b2p
        return jax.nn.softmax(logits, axis=1)

    # Reference 2: original f32 nn.Module semantics — looser sanity check (bf16 noise).
    def ref_f32(xq):
        return jax.nn.softmax(jnp.maximum(xq @ w1 + b1, 0.0) @ w2 + b2, axis=1)

    assert jnp.allclose(probs, ref_mixed(x), atol=1e-4), "mismatch vs mixed-precision reference"
    assert jnp.allclose(probs, ref_f32(x), atol=3e-2), "mismatch vs f32 module reference"
    assert jnp.allclose(jnp.sum(probs, axis=1), 1.0, atol=1e-4), "probs do not sum to 1"

    # Multi-tile smoke test: exercises >= 2 grid steps and the ragged last tile.
    x_big = jax.random.normal(kb, (300, state_dim), jnp.float32)
    probs_big = jax.block_until_ready(policy_net_forward(x_big, packed))
    assert probs_big.shape == (300, action_dim)
    assert jnp.allclose(probs_big, ref_mixed(x_big), atol=1e-4), "mismatch on multi-tile batch"
    assert jnp.allclose(jnp.sum(probs_big, axis=1), 1.0, atol=1e-4), "big-batch probs do not sum to 1"

    print("KERNEL_OK")
</pallas_src>

<mosaic_0001>
module attributes {stable_mosaic.version = 11 : i64} {
  func.func @_policy_kernel(%arg0: i32, %arg1: memref<2x4xf32, #tpu.memory_space<vmem>>, %arg2: memref<4x32xbf16, #tpu.memory_space<vmem>>, %arg3: memref<1x32xf32, #tpu.memory_space<vmem>>, %arg4: memref<32x8xbf16, #tpu.memory_space<vmem>>, %arg5: memref<1x8xf32, #tpu.memory_space<vmem>>, %arg6: memref<2x8xf32, #tpu.memory_space<vmem>>) attributes {dimension_semantics = [#tpu.dimension_semantics<parallel>], iteration_bounds = array<i64: 1>, scalar_prefetch = 0 : i64, scratch_operands = 0 : i64, tpu.core_type = #tpu.core_type<tc>, window_params = [{transform_indices = @transform_0, window_bounds = array<i64: 2, 4>}, {pipeline_mode = #tpu.pipeline_mode<synchronous>, transform_indices = @transform_1, window_bounds = array<i64: 4, 32>}, {pipeline_mode = #tpu.pipeline_mode<synchronous>, transform_indices = @transform_2, window_bounds = array<i64: 1, 32>}, {pipeline_mode = #tpu.pipeline_mode<synchronous>, transform_indices = @transform_3, window_bounds = array<i64: 32, 8>}, {pipeline_mode = #tpu.pipeline_mode<synchronous>, transform_indices = @transform_4, window_bounds = array<i64: 1, 8>}, {transform_indices = @transform_5, window_bounds = array<i64: 2, 8>}]} {
    %c0 = arith.constant 0 : index
    %c0_0 = arith.constant 0 : index
    %0 = vector.load %arg1[%c0, %c0_0] : memref<2x4xf32, #tpu.memory_space<vmem>>, vector<2x4xf32>
    %1 = arith.truncf %0 : vector<2x4xf32> to vector<2x4xbf16>
    %c0_1 = arith.constant 0 : index
    %c0_2 = arith.constant 0 : index
    %2 = vector.load %arg2[%c0_1, %c0_2] : memref<4x32xbf16, #tpu.memory_space<vmem>>, vector<4x32xbf16>
    %cst = arith.constant dense<0.000000e+00> : vector<2x32xf32>
    %3 = tpu.matmul %1, %2, %cst {dimension_numbers = #tpu.dot_dimension_numbers<[1], [0], [0], [1], [0, 0, 1, 1], [], []>} : vector<2x4xbf16>, vector<4x32xbf16>, vector<2x32xf32> -> vector<2x32xf32>
    %c0_3 = arith.constant 0 : index
    %c0_4 = arith.constant 0 : index
    %4 = vector.load %arg3[%c0_3, %c0_4] : memref<1x32xf32, #tpu.memory_space<vmem>>, vector<1x32xf32>
    %5 = vector.broadcast %4 : vector<1x32xf32> to vector<2x32xf32>
    %6 = arith.addf %3, %5 : vector<2x32xf32>
    %cst_5 = arith.constant 0.000000e+00 : f32
    %7 = vector.broadcast %cst_5 : f32 to vector<2x32xf32>
    %8 = arith.maximumf %6, %7 : vector<2x32xf32>
    %9 = arith.truncf %8 : vector<2x32xf32> to vector<2x32xbf16>
    %c0_6 = arith.constant 0 : index
    %c0_7 = arith.constant 0 : index
    %10 = vector.load %arg4[%c0_6, %c0_7] : memref<32x8xbf16, #tpu.memory_space<vmem>>, vector<32x8xbf16>
    %cst_8 = arith.constant dense<0.000000e+00> : vector<2x8xf32>
    %11 = tpu.matmul %9, %10, %cst_8 {dimension_numbers = #tpu.dot_dimension_numbers<[1], [0], [0], [1], [0, 0, 1, 1], [], []>} : vector<2x32xbf16>, vector<32x8xbf16>, vector<2x8xf32> -> vector<2x8xf32>
    %c0_9 = arith.constant 0 : index
    %c0_10 = arith.constant 0 : index
    %12 = vector.load %arg5[%c0_9, %c0_10] : memref<1x8xf32, #tpu.memory_space<vmem>>, vector<1x8xf32>
    %13 = vector.broadcast %12 : vector<1x8xf32> to vector<2x8xf32>
    %14 = arith.addf %11, %13 : vector<2x8xf32>
    %cst_11 = arith.constant dense<0xFF800000> : vector<2xf32>
    %15 = vector.multi_reduction <maximumf>, %14, %cst_11 [1] : vector<2x8xf32> to vector<2xf32>
    %16 = vector.shape_cast %15 : vector<2xf32> to vector<2x1xf32>
    %17 = vector.broadcast %16 : vector<2x1xf32> to vector<2x8xf32>
    %18 = arith.subf %14, %17 : vector<2x8xf32>
    %19 = math.exp %18 : vector<2x8xf32>
    %cst_12 = arith.constant dense<0.000000e+00> : vector<2xf32>
    %20 = vector.multi_reduction <add>, %19, %cst_12 [1] : vector<2x8xf32> to vector<2xf32>
    %21 = vector.shape_cast %20 : vector<2xf32> to vector<2x1xf32>
    %22 = tpu.reciprocal %21 {approx = true} : vector<2x1xf32> -> vector<2x1xf32>
    %23 = arith.mulf %21, %22 : vector<2x1xf32>
    %cst_13 = arith.constant 2.000000e+00 : f32
    %24 = vector.broadcast %cst_13 : f32 to vector<2x1xf32>
    %25 = arith.subf %24, %23 : vector<2x1xf32>
    %26 = arith.mulf %22, %25 : vector<2x1xf32>
    %27 = vector.broadcast %26 : vector<2x1xf32> to vector<2x8xf32>
    %28 = arith.mulf %19, %27 : vector<2x8xf32>
    %c0_14 = arith.constant 0 : index
    %c0_15 = arith.constant 0 : index
    %29 = vector.load %arg6[%c0_14, %c0_15] : memref<2x8xf32, #tpu.memory_space<vmem>>, vector<2x8xf32>
    tpu.vector_store %arg6[%c0_14, %c0_15], %28 {strides = array<i32>} : memref<2x8xf32, #tpu.memory_space<vmem>>, vector<2x8xf32>,
    return
  }
  func.func @transform_0(%arg0: i32) -> (i32, i32) {
    %c0_i32 = arith.constant 0 : i32
    %c0_i32_0 = arith.constant 0 : i32
    return %arg0, %c0_i32 : i32, i32
  }
  func.func @transform_1(%arg0: i32) -> (i32, i32) {
    %c0_i32 = arith.constant 0 : i32
    %c0_i32_0 = arith.constant 0 : i32
    %c0_i32_1 = arith.constant 0 : i32
    return %c0_i32, %c0_i32_0 : i32, i32
  }
  func.func @transform_2(%arg0: i32) -> (i32, i32) {
    %c0_i32 = arith.constant 0 : i32
    %c0_i32_0 = arith.constant 0 : i32
    %c0_i32_1 = arith.constant 0 : i32
    return %c0_i32, %c0_i32_0 : i32, i32
  }
  func.func @transform_3(%arg0: i32) -> (i32, i32) {
    %c0_i32 = arith.constant 0 : i32
    %c0_i32_0 = arith.constant 0 : i32
    %c0_i32_1 = arith.constant 0 : i32
    return %c0_i32, %c0_i32_0 : i32, i32
  }
  func.func @transform_4(%arg0: i32) -> (i32, i32) {
    %c0_i32 = arith.constant 0 : i32
    %c0_i32_0 = arith.constant 0 : i32
    %c0_i32_1 = arith.constant 0 : i32
    return %c0_i32, %c0_i32_0 : i32, i32
  }
  func.func @transform_5(%arg0: i32) -> (i32, i32) {
    %c0_i32 = arith.constant 0 : i32
    %c0_i32_0 = arith.constant 0 : i32
    return %arg0, %c0_i32 : i32, i32
  }
}

</mosaic_0001>

<bundles_post_ra>
// kernel: tpu_custom_call.1
= control target key start
LH: loop header
LB: loop body
LE: loop exit
PB: predicated region body
PF: predicated region fallthrough
CT: control target
= control target key end

     0   :  { %vm36_vm0 = vcmask 1041408   ;;  %v237_v1 = vmov 0.0   ;;  %vm238_vm1 = vmmov 0   ;;  %vm32_vm2 = vcmask 31744   ;;  %s303_s0 = inlined_call_operand.vmem [shape: f32[2,4], index: 0, kind: input, shape index: {}]   ;;  %s304_s1 = inlined_call_operand.vmem [shape: bf16[4,32], index: 1, kind: input, shape index: {}]   ;;  %s305_s2 = inlined_call_operand.vmem [shape: f32[1,32], index: 2, kind: input, shape index: {}]   ;;  %s306_s3 = inlined_call_operand.vmem [shape: bf16[32,8], index: 3, kind: input, shape index: {}]   ;;  %s307_s4 = inlined_call_operand.vmem [shape: f32[1,8], index: 4, kind: input, shape index: {}]   ;;  %s308_s5 = inlined_call_operand.hbm [shape: f32[2,8], index: 5, kind: output, shape index: {}]  }
   0x1   :  { %v24_v0 = vld [vmem:[%s304_s1] sm:$0x3]  ;;  %190 = vmatprep.subr.bf16.mxu0 %v237_v1  ;;  %192 = vmatprep.mubr.msk.bf16.mxu0 %vm238_vm1, %v237_v1 }
   0x2   :  { %v38_v2 = vsel %vm36_vm0, %v24_v0, 0  ;;  %v22_v3 = vld [vmem:[%s303_s0] sm:$0x3]  ;;  %196 = vmatprep.subr.bf16.mxu1 %v237_v1  ;;  %200 = vmatprep.mubr.msk.bf16.mxu1 %vm238_vm1, %v237_v1 }
   0x3   :  { %191 = vmatpush3.bf16.msra.mxu0 %v38_v2  ;;  %v23_v4 = vpack.c.bf16 %v22_v3, %v22_v3 }
   0x4   :  { %10 = vsyncpa [#allocation3], 0  ;;  %v207_v5 = vld [vmem:[%s306_s3] sm:$0xff]   ;;  %v208_v6 = vld [vmem:[%s306_s3 + $0x8] sm:$0xff]   ;;  %vm105_vm3 = vcmask 261120   ;;  %vm149_vm4 = vcmask 58368  }
   0x5   :  { %197 = vmatpush3.bf16.msra.mxu1 %v207_v5  ;;  %v179_v7 = vld [vmem:[%s305_s2] ss:$0 sm:$0xff]  ;;  %s239_s2 = smov [#allocation2]  }
   0x6   :  { %193 = vmatmul.mubr.msk.bf16.vlgmr.msra.gmra.mrb[0].mxu0 %vm32_vm2, %v23_v4  ;;  %198 = vmatprep.subr.bf16.mxu1 %v237_v1  ;;  %v181_v15 = vld [vmem:[%s307_s4] ss:$0 sm:$0xff]  ;;  %s171_s3 = sshll.u32 %s239_s2, 4  ;;  %s172_s3 = int_to_ptr.vmem [resolvable:$true] %s171_s3 }
   0x7   :  { %s213_s4 = scalar_lea.vmem %s172_s3, 32  ;;  %p218_p1 = scmp.lt.s32.totalorder %s172_s3, %s172_s3 }
   0x8   :  { %p214_p0 = scmp.ne.s32.totalorder %s172_s3, %s213_s4  ;;  %p219_p2 = scmp.lt.s32.totalorder %s213_s4, %s213_s4 }
   0x9   :  { %199 = vmatpush3.bf16.msra.mxu1 %v208_v6 }
   0xa   :  { %p220_p3 = por %p219_p2, %p218_p1 }
   0xc   :  { %p221_p4 = pnand %p220_p3, %p214_p0 }
  0xd9   :  { %v74_v8 = vpop.f32.mrb[0].mxu0 }
  0xda   :  { %v75_v9 = vadd.f32 %v179_v7, %v74_v8  ;;  %v194_v10 = vpop.f32.mrb[1].mxu0 }
  0xdb   :  { %v77_v11 = vpop.f32.mrb[2].mxu0 }
  0xdc   :  { %v80_v12 = vmax.f32 %v75_v9, 0.0  ;;  %v195_v13 = vpop.f32.mrb[3].mxu0 }
  0xde   :  { %v81_v14 = vpack.c.bf16 %v80_v12, %v80_v12 }
  0xe0   :  { %201 = vmatmul.mubr.msk.bf16.vlgmr.msra.gmra.mrb[0].mxu1 %vm105_vm3, %v81_v14 }
 0x1b3   :  { %v143_v16 = vpop.f32.mrb[0].mxu1 }
 0x1b4   :  { %v144_v17 = vadd.f32 %v181_v15, %v143_v16  ;;  %v202_v18 = vpop.f32.mrb[1].mxu1 }
 0x1b5   :  { %v146_v19 = vpop.f32.mrb[2].mxu1 }
 0x1b6   :  { %v203_v20 = vpop.f32.mrb[3].mxu1  ;;  %v150_v21 = vsel %vm149_vm4, %v144_v17, -inf }
 0x1b7   :  { %151 = vmax.xlane.f32.xlu0 %v150_v21 }
 0x244   :  { %v152_v22 = vpop.xlane.xlu0 %151 }
 0x245   :  { %v153_v23 = vsub.f32 %v144_v17, %v152_v22 }
 0x247   :  { %v154_v24 = vmul.f32 1.442695, %v153_v23 }
 0x249   :  { %209 = vpow2.f32 %v154_v24 }
 0x253   :  { %v210_v25 = vpop.eup %209 }
 0x254   :  { %v156_v26 = vsel %vm149_vm4, %v210_v25, 0.0 }
 0x255   :  { %157 = vadd.xlane.f32.xlu0 %v156_v26 }
 0x2e2   :  { %v158_v27 = vpop.xlane.xlu0 %157 }
 0x2e3   :  { %211 = vrcp.f32 %v158_v27 }
 0x2ed   :  { %v212_v28 = vpop.eup %211 }
 0x2ee   :  { %v160_v29 = vmul.f32 %v212_v28, %v158_v27 }
 0x2f0   :  { %v161_v30 = vsub.f32 2.0, %v160_v29 }
 0x2f2   :  { %v162_v31 = vmul.f32 %v212_v28, %v161_v30 }
 0x2f4   :  { %v163_v32 = vmul.f32 %v210_v25, %v162_v31 }
 0x2f6   :  { %164 = vst.msk [vmem:[#allocation2] sm:$0x3] %vm149_vm4, %v163_v32 }
 0x2f7   :  { %224 = shalt.err (!%p221_p4)
}
 0x2f8   :  { %s225_s30 = scalar_lea.hbm %s308_s5, 32 }
 0x2f9   :  { %p226_p5 = scmp.ne.s32.totalorder %s308_s5, %s225_s30  ;;  %p229_p6 = scmp.lt.u32.totalorder %s225_s30, %s308_s5 }
 0x2fb   :  { %p231_p7 = pnand %p229_p6, %p226_p5 }
 0x2fd   :  { %234 = shalt.err (!%p231_p7)
}
 0x2fe   :  { %174 = dma.vmem_to_hbm [thread:$0]  %s172_s3, 32, %s308_s5, [#allocation3]  }
 0x2ff   :  { %235 = dma.done.wait [#allocation3], 32  }
 0x300   :  { %236 = vsyncadd [#allocation3], 4294967264 }
 0x301   :  { %178 = vsyncpa [#allocation3], 1 }

</bundles_post_ra>
